<compile_context>
chip_gen: v6e
topology: v6e:2x2x1
jax: 0.10.0
libtpu: 0.0.40
codegen_flags: <defaults>
</compile_context>

<pallas_src>
import functools
import math

import jax
import jax.numpy as jnp
from jax.experimental import pallas as pl
from jax.experimental.pallas import tpu as pltpu


def _round_up(x, m):
    return (x + m - 1) // m * m


# ---------------------------------------------------------------------------
# Phase 1: input projection over all timesteps (parallel over row blocks).
# Accumulate + bias add in f32; the only rounding is the final cast to the gi
# storage dtype (bf16 when mxu_dtype=bf16).
# ---------------------------------------------------------------------------
def _input_proj_kernel(x_ref, w_ref, b_ref, gi_ref):
    gi_ref[...] = (
        jnp.dot(x_ref[...], w_ref[...], preferred_element_type=jnp.float32)
        + b_ref[...].astype(jnp.float32)
    ).astype(gi_ref.dtype)


# ---------------------------------------------------------------------------
# Phase 2: blocked sequential GRU recurrence; hidden state carried in VMEM.
# ---------------------------------------------------------------------------
def _gru_recurrence_kernel(gi_ref, h0_ref, whh_ref, bhn_ref,
                           out_ref, hn_ref, h_scratch, *, hidden_pad, unroll):
    tb = pl.program_id(0)
    Hp = hidden_pad
    t_blk = gi_ref.shape[0]

    @pl.when(tb == 0)
    def _():
        h_scratch[...] = h0_ref[...].astype(jnp.float32)

    # Hoist loop-invariant loads out of the time loop (JAX does not CSE
    # broadcasts inside the loop body).
    whh = whh_ref[...]                          # (Hp, 3Hp), MXU dtype
    bhn = bhn_ref[...].astype(jnp.float32)      # (1, Hp)
    mxu_dtype = whh.dtype

    def step(t, h):
        gi_t = gi_ref[t].astype(jnp.float32)    # (B, 3Hp), input biases folded
        # One fused hidden-side MXU matmul per step (gates r|z|n on lanes,
        # each gate 128-lane aligned because Hp % 128 == 0).
        gh = jnp.dot(h.astype(mxu_dtype), whh,
                     preferred_element_type=jnp.float32)      # (B, 3Hp)
        r = jax.nn.sigmoid(gi_t[:, :Hp] + gh[:, :Hp])
        z = jax.nn.sigmoid(gi_t[:, Hp:2 * Hp] + gh[:, Hp:2 * Hp])
        # b_hn stays inside the r * (...) term (PyTorch semantics).
        n = jnp.tanh(gi_t[:, 2 * Hp:] + r * (gh[:, 2 * Hp:] + bhn))
        # h_new = (1-z)*n + z*h, rewritten to save one VPU multiply.
        h_new = n + z * (h - n)
        out_ref[t] = h_new.astype(out_ref.dtype)    # lane-dense (Hp % 128 == 0)
        return h_new

    # Partial unroll keeps LLO scheduling visibility without blowing the
    # 64-vreg file (a full 32-deep unroll spills at realistic B*Hp).
    h_final = jax.lax.fori_loop(0, t_blk, step, h_scratch[...], unroll=unroll)
    h_scratch[...] = h_final

    @pl.when(tb == pl.num_programs(0) - 1)
    def _():
        hn_ref[...] = h_final.astype(hn_ref.dtype)


def _pick_time_block(T, B, Hp, gi_itemsize, out_itemsize, *,
                     vmem_budget_bytes, target=32):
    """Largest divisor of T whose double-buffered gi/out streaming blocks fit
    the VMEM budget (weights/h0 ride on the remaining headroom)."""
    per_t = 2 * B * (3 * Hp * gi_itemsize + Hp * out_itemsize)   # 2 = dbl buffer
    cap = max(1, vmem_budget_bytes // per_t)
    limit = int(min(target, cap))
    if T <= limit:
        return T
    for cand in range(limit, 0, -1):
        if T % cand == 0:
            return cand
    return 1


def encoder_rnn_forward(x, h0, w_ih, w_hh, b_ih, b_hh, *,
                        mxu_dtype=jnp.float32, out_dtype=None,
                        time_block=None, vmem_budget_bytes=24 << 20):
    """GRU forward matching torch.nn.GRU (single layer, unidirectional).

    x:    (T, B, I)  float32, seq-major
    h0:   (1, B, H)  float32
    w_ih: (3H, I)    torch weight_ih_l0 (gate order r, z, n)
    w_hh: (3H, H)    torch weight_hh_l0
    b_ih: (3H,)      torch bias_ih_l0
    b_hh: (3H,)      torch bias_hh_l0

    mxu_dtype=jnp.bfloat16 on v6e/v7x for peak matmul throughput (gate math and
    the hidden carry stay f32).  On v7x (64 MiB VMEM) pass a smaller
    vmem_budget_bytes (e.g. 12<<20).  Returns (output (T,B,H), hidden (1,B,H)).
    """
    T, B, I = x.shape
    H = h0.shape[-1]
    out_dtype = x.dtype if out_dtype is None else out_dtype
    gi_dtype = mxu_dtype        # bf16 path halves the gi HBM round trip

    # Pad H to a lane multiple; padded lanes stay exactly 0 in the recurrence.
    Hp = _round_up(H, 128)
    f32 = jnp.float32
    w_ih_g = w_ih.astype(f32).reshape(3, H, I)
    w_hh_g = w_hh.astype(f32).reshape(3, H, H)
    b_i = b_ih.astype(f32).reshape(3, H)
    b_h = b_hh.astype(f32).reshape(3, H)

    def pad_cols(m):            # (rows, H) -> (rows, Hp)
        return jnp.pad(m, ((0, 0), (0, Hp - H)))

    # x @ W form, gates concatenated r|z|n on lanes, each gate Hp wide.
    wih_packed = jnp.concatenate(
        [pad_cols(w_ih_g[g].T) for g in range(3)], axis=1).astype(mxu_dtype)
    whh_packed = jnp.pad(
        jnp.concatenate([pad_cols(w_hh_g[g].T) for g in range(3)], axis=1),
        ((0, Hp - H), (0, 0))).astype(mxu_dtype)                 # (Hp, 3Hp)
    # r/z biases folded; b_in goes to phase 1, b_hn stays on the hidden side.
    bi_packed = jnp.concatenate(
        [pad_cols((b_i[0] + b_h[0])[None]),
         pad_cols((b_i[1] + b_h[1])[None]),
         pad_cols(b_i[2][None])], axis=1)                        # (1, 3Hp) f32
    bhn = pad_cols(b_h[2][None])                                 # (1, Hp)  f32
    h0_p = jnp.pad(h0[0].astype(f32), ((0, 0), (0, Hp - H)))     # (B, Hp)

    # --- phase 1: hoisted input projection for all timesteps -----------------
    TB = T * B
    x_flat = x.reshape(TB, I).astype(mxu_dtype)
    # 512-row blocks sit near the measured HBM roofline sweet spot (~85% vs
    # ~63% at 256); small problems take a single block.
    row_blk = TB if TB <= 1024 else 512
    gi = pl.pallas_call(
        _input_proj_kernel,
        grid_spec=pltpu.PrefetchScalarGridSpec(
            num_scalar_prefetch=0,
            grid=(pl.cdiv(TB, row_blk),),
            in_specs=[
                pl.BlockSpec((row_blk, I), lambda r: (r, 0)),
                pl.BlockSpec((I, 3 * Hp), lambda r: (0, 0)),
                pl.BlockSpec((1, 3 * Hp), lambda r: (0, 0)),
            ],
            out_specs=pl.BlockSpec((row_blk, 3 * Hp), lambda r: (r, 0)),
        ),
        out_shape=jax.ShapeDtypeStruct((TB, 3 * Hp), gi_dtype),
        compiler_params=pltpu.CompilerParams(
            # TODO(synk): on v7x use pltpu.CORE_PARALLEL here so row blocks
            # actually shard across the 2 TensorCores; "parallel" is enough on
            # the single-TC v5e/v6e.
            dimension_semantics=("parallel",),
        ),
    )(x_flat, wih_packed, bi_packed)
    gi = gi.reshape(T, B, 3 * Hp)

    # --- phase 2: sequential recurrence, t_blk timesteps per grid step -------
    if time_block is not None:
        t_blk = time_block
    else:
        t_blk = _pick_time_block(
            T, B, Hp, jnp.dtype(gi_dtype).itemsize, jnp.dtype(out_dtype).itemsize,
            vmem_budget_bytes=vmem_budget_bytes)
    assert T % t_blk == 0
    kernel = functools.partial(_gru_recurrence_kernel, hidden_pad=Hp,
                               unroll=min(t_blk, 8))
    # NOTE: W_hh / h0 / b_hn have constant index maps yet are double-buffered
    # by default; at large H single-buffering them (pipeline_mode) would free
    # one (Hp,3Hp) block of VMEM for a larger t_blk.
    # TODO(synk): on v7x add a leading B-block grid axis marked CORE_PARALLEL
    # (recurrence is independent per batch row) to use the second TensorCore.
    out, hn = pl.pallas_call(
        kernel,
        grid_spec=pltpu.PrefetchScalarGridSpec(
            num_scalar_prefetch=0,
            grid=(T // t_blk,),
            in_specs=[
                pl.BlockSpec((t_blk, B, 3 * Hp), lambda tb: (tb, 0, 0)),  # gi slab
                pl.BlockSpec((B, Hp), lambda tb: (0, 0)),                 # h0
                pl.BlockSpec((Hp, 3 * Hp), lambda tb: (0, 0)),            # fused W_hh
                pl.BlockSpec((1, Hp), lambda tb: (0, 0)),                 # b_hn
            ],
            out_specs=[
                pl.BlockSpec((t_blk, B, Hp), lambda tb: (tb, 0, 0)),      # output slab
                pl.BlockSpec((B, Hp), lambda tb: (0, 0)),                 # final hidden
            ],
            scratch_shapes=[pltpu.VMEM((B, Hp), jnp.float32)],
        ),
        out_shape=(
            jax.ShapeDtypeStruct((T, B, Hp), out_dtype),
            jax.ShapeDtypeStruct((B, Hp), out_dtype),
        ),
        compiler_params=pltpu.CompilerParams(
            dimension_semantics=("arbitrary",),   # time recurrence is serial
        ),
    )(gi, h0_p, whh_packed, bhn)

    # Drop the lane padding.
    return out[:, :, :H], hn[None, :, :H]


def gru_reference(x, h0, w_ih, w_hh, b_ih, b_hh):
    """Pure-JAX reference matching torch.nn.GRU semantics."""
    H = h0.shape[-1]

    def step(h, x_t):
        gi = x_t @ w_ih.T + b_ih
        gh = h @ w_hh.T + b_hh
        i_r, i_z, i_n = gi[:, :H], gi[:, H:2 * H], gi[:, 2 * H:]
        h_r, h_z, h_n = gh[:, :H], gh[:, H:2 * H], gh[:, 2 * H:]
        r = jax.nn.sigmoid(i_r + h_r)
        z = jax.nn.sigmoid(i_z + h_z)
        n = jnp.tanh(i_n + r * h_n)
        h_new = (1.0 - z) * n + z * h
        return h_new, h_new

    h_last, outs = jax.lax.scan(step, h0[0], x)
    return outs, h_last[None]


if __name__ == "__main__":
    # Small demo shapes consistent with nn.GRU(input_size, hidden_size).
    # NOTE: B=2, H=32 leaves >90% of each vreg and the MXU idle — these shapes
    # validate correctness, not performance (pad/tile B >= 8 for benchmarks).
    T, B, I, H = 8, 2, 16, 32

    key = jax.random.PRNGKey(0)
    kx, kh, k1, k2, k3, k4 = jax.random.split(key, 6)

    # Parameter init mimicking PyTorch: U(-1/sqrt(H), 1/sqrt(H)).
    bound = 1.0 / math.sqrt(H)
    w_ih = jax.random.uniform(k1, (3 * H, I), jnp.float32, -bound, bound)
    w_hh = jax.random.uniform(k2, (3 * H, H), jnp.float32, -bound, bound)
    b_ih = jax.random.uniform(k3, (3 * H,), jnp.float32, -bound, bound)
    b_hh = jax.random.uniform(k4, (3 * H,), jnp.float32, -bound, bound)

    x = jax.random.normal(kx, (T, B, I), jnp.float32)
    h0 = 0.1 * jax.random.normal(kh, (1, B, H), jnp.float32)

    ref_out, ref_hn = gru_reference(x, h0, w_ih, w_hh, b_ih, b_hh)

    # f32 path (near-exact check).
    out, hn = encoder_rnn_forward(x, h0, w_ih, w_hh, b_ih, b_hh)
    jax.block_until_ready((out, hn))
    assert out.shape == (T, B, H) and hn.shape == (1, B, H)
    assert jnp.allclose(out, ref_out, atol=1e-5, rtol=1e-5)
    assert jnp.allclose(hn, ref_hn, atol=1e-5, rtol=1e-5)

    # bf16-MXU path (v6e/v7x perf config): bf16 weights/gi/output, f32 carry
    # and gate math — only small rounding error vs. the f32 reference.
    out_bf, hn_bf = encoder_rnn_forward(x, h0, w_ih, w_hh, b_ih, b_hh,
                                        mxu_dtype=jnp.bfloat16,
                                        out_dtype=jnp.bfloat16)
    jax.block_until_ready((out_bf, hn_bf))
    assert jnp.allclose(out_bf.astype(jnp.float32), ref_out, atol=0.1, rtol=0.0)
    assert jnp.allclose(hn_bf.astype(jnp.float32), ref_hn, atol=0.1, rtol=0.0)

    print("KERNEL_OK")
</pallas_src>

<mosaic_0001>
module attributes {stable_mosaic.version = 11 : i64} {
  func.func @_input_proj_kernel(%arg0: i32, %arg1: memref<16x16xf32, #tpu.memory_space<vmem>>, %arg2: memref<16x384xf32, #tpu.memory_space<vmem>>, %arg3: memref<1x384xf32, #tpu.memory_space<vmem>>, %arg4: memref<16x384xf32, #tpu.memory_space<vmem>>) attributes {dimension_semantics = [#tpu.dimension_semantics<parallel>], iteration_bounds = array<i64: 1>, scalar_prefetch = 0 : i64, scratch_operands = 0 : i64, tpu.core_type = #tpu.core_type<tc>, window_params = [{transform_indices = @transform_0, window_bounds = array<i64: 16, 16>}, {pipeline_mode = #tpu.pipeline_mode<synchronous>, transform_indices = @transform_1, window_bounds = array<i64: 16, 384>}, {pipeline_mode = #tpu.pipeline_mode<synchronous>, transform_indices = @transform_2, window_bounds = array<i64: 1, 384>}, {transform_indices = @transform_3, window_bounds = array<i64: 16, 384>}]} {
    %c0 = arith.constant 0 : index
    %c0_0 = arith.constant 0 : index
    %0 = vector.load %arg1[%c0, %c0_0] : memref<16x16xf32, #tpu.memory_space<vmem>>, vector<16x16xf32>
    %c0_1 = arith.constant 0 : index
    %c0_2 = arith.constant 0 : index
    %1 = vector.load %arg2[%c0_1, %c0_2] : memref<16x384xf32, #tpu.memory_space<vmem>>, vector<16x384xf32>
    %cst = arith.constant dense<0.000000e+00> : vector<16x384xf32>
    %2 = tpu.matmul %0, %1, %cst {dimension_numbers = #tpu.dot_dimension_numbers<[1], [0], [0], [1], [0, 0, 1, 1], [], []>} : vector<16x16xf32>, vector<16x384xf32>, vector<16x384xf32> -> vector<16x384xf32>
    %c0_3 = arith.constant 0 : index
    %c0_4 = arith.constant 0 : index
    %3 = vector.load %arg3[%c0_3, %c0_4] : memref<1x384xf32, #tpu.memory_space<vmem>>, vector<1x384xf32>
    %4 = vector.broadcast %3 : vector<1x384xf32> to vector<16x384xf32>
    %5 = arith.addf %2, %4 : vector<16x384xf32>
    %c0_5 = arith.constant 0 : index
    %c0_6 = arith.constant 0 : index
    %6 = vector.load %arg4[%c0_5, %c0_6] : memref<16x384xf32, #tpu.memory_space<vmem>>, vector<16x384xf32>
    tpu.vector_store %arg4[%c0_5, %c0_6], %5 {strides = array<i32>} : memref<16x384xf32, #tpu.memory_space<vmem>>, vector<16x384xf32>,
    return
  }
  func.func @transform_0(%arg0: i32) -> (i32, i32) {
    %c0_i32 = arith.constant 0 : i32
    %c0_i32_0 = arith.constant 0 : i32
    return %arg0, %c0_i32 : i32, i32
  }
  func.func @transform_1(%arg0: i32) -> (i32, i32) {
    %c0_i32 = arith.constant 0 : i32
    %c0_i32_0 = arith.constant 0 : i32
    %c0_i32_1 = arith.constant 0 : i32
    return %c0_i32, %c0_i32_0 : i32, i32
  }
  func.func @transform_2(%arg0: i32) -> (i32, i32) {
    %c0_i32 = arith.constant 0 : i32
    %c0_i32_0 = arith.constant 0 : i32
    %c0_i32_1 = arith.constant 0 : i32
    return %c0_i32, %c0_i32_0 : i32, i32
  }
  func.func @transform_3(%arg0: i32) -> (i32, i32) {
    %c0_i32 = arith.constant 0 : i32
    %c0_i32_0 = arith.constant 0 : i32
    return %arg0, %c0_i32 : i32, i32
  }
}

</mosaic_0001>

<bundles_post_ra>
// kernel: tpu_custom_call.1
= control target key start
LH: loop header
LB: loop body
LE: loop exit
PB: predicated region body
PF: predicated region fallthrough
CT: control target
= control target key end

     0   :  { %8 = vsyncpa [#allocation3], 0  ;;  %s386_s0 = inlined_call_operand.hbm [shape: f32[16,16], index: 0, kind: input, shape index: {}]   ;;  %s387_s1 = inlined_call_operand.hbm [shape: f32[16,384], index: 1, kind: input, shape index: {}]   ;;  %s388_s2 = inlined_call_operand.vmem [shape: f32[1,384], index: 2, kind: input, shape index: {}]   ;;  %s389_s3 = inlined_call_operand.hbm [shape: f32[16,384], index: 3, kind: output, shape index: {}]  }
   0x1   :  { %9 = vsyncpa [#allocation6], 0 }
   0x2   :  { %10 = vsyncpa [#allocation4], 0  ;;  %s340_s12 = smov [#allocation2]  }
   0x3   :  { %s16_s13 = sshll.u32 %s340_s12, 4  ;;  %s17_s13 = int_to_ptr.vmem [resolvable:$true] %s16_s13 }
   0x4   :  { %s282_s14 = scalar_lea.vmem %s17_s13, 256  ;;  %p287_p1 = scmp.lt.s32.totalorder %s17_s13, %s17_s13 }
   0x5   :  { %p283_p0 = scmp.ne.s32.totalorder %s17_s13, %s282_s14  ;;  %p288_p2 = scmp.lt.s32.totalorder %s282_s14, %s282_s14 }
   0x7   :  { %p289_p3 = por %p288_p2, %p287_p1 }
   0x9   :  { %p290_p4 = pnand %p289_p3, %p283_p0 }
   0xb   :  { %293 = shalt.err (!%p290_p4)
}
   0xc   :  { %s341_s15 = smov 128   ;;  %s342_s16 = smov 8  }
   0xd   :  { %22 = dma.hbm_to_vmem [thread:$0]  %s386_s0, 256, %s17_s13, [#allocation3], %s341_s15, %s341_s15, %s342_s16  }
   0xe   :  { %s343_s19 = smov [#allocation5]  }
   0xf   :  { %s28_s20 = sshll.u32 %s343_s19, 4  ;;  %s29_s20 = int_to_ptr.vmem [resolvable:$true] %s28_s20 }
  0x10   :  { %s302_s21 = scalar_lea.vmem %s29_s20, 768  ;;  %p307_p6 = scmp.lt.s32.totalorder %s29_s20, %s29_s20 }
  0x11   :  { %p303_p5 = scmp.ne.s32.totalorder %s29_s20, %s302_s21  ;;  %p308_p7 = scmp.lt.s32.totalorder %s302_s21, %s302_s21 }
  0x13   :  { %p309_p8 = por %p308_p7, %p307_p6 }
  0x15   :  { %p310_p9 = pnand %p309_p8, %p303_p5 }
  0x17   :  { %313 = shalt.err (!%p310_p9)
}
  0x18   :  { %s344_s22 = smov 384   ;;  %s345_s23 = smov 24  }
  0x19   :  { %34 = dma.hbm_to_vmem [thread:$0]  %s387_s1, 768, %s29_s20, [#allocation6], %s344_s22, %s344_s22, %s345_s23  }
  0x1a   :  { %334 = dma.done.wait [#allocation3], 256  }
  0x1b   :  { %335 = vsyncadd [#allocation3], 4294967040 }
  0x1c   :  { %336 = dma.done.wait [#allocation6], 768  }
  0x1d   :  { %337 = vsyncadd [#allocation6], 4294966528  ;;  %v346_v0 = vmov 0.0   ;;  %v49_v1 = vld [vmem:[#allocation5 + $0x20] sm:$0xff]  ;;  %v48_v2 = vld [vmem:[#allocation5 + $0x18] sm:$0xff]  ;;  %vm68_vm0 = vcmask 130048   ;;  %v53_v9 = vlaneseq }
  0x1e   :  { %139 = vmatprep.mubr.f32.mxu0 %v346_v0  ;;  %v46_v3 = vld [vmem:[#allocation5 + $0x8] sm:$0xff]  ;;  %103 = vmatprep.subr.mxu0 %v49_v1  ;;  %v45_v5 = vld [vmem:[#allocation5] sm:$0xff]  ;;  %v43_v6 = vld [vmem:[#allocation2] sm:$0xff]  ;;  %s347_s26 = smov [#allocation7]  }
  0x1f   :  { %v50_v4 = vld [vmem:[#allocation5 + $0x28] sm:$0xff]  ;;  %104 = vmatpush1.msra.mxu0 %v48_v2  ;;  %v47_v7 = vld [vmem:[#allocation5 + $0x10] sm:$0xff]  ;;  %v44_v8 = vld [vmem:[#allocation2 + $0x8] sm:$0xff]  ;;  %263 = vmatprep.mubr.msk.f32.mxu1 %vm68_vm0, %v43_v6  ;;  %v54_v10 = vshrl.u32 %v53_v9, 7  ;;  %s238_s27 = sshll.u32 %s347_s26, 4  ;;  %s239_s27 = int_to_ptr.vmem [resolvable:$true] %s238_s27 }
  0x20   :  { %259 = vmatprep.subr.mxu1 %v50_v4  ;;  %105 = vmatprep.subr.mxu0 %v46_v3  ;;  %v51_v12 = vld [vmem:[%s388_s2] sm:$0x7]  ;;  %s314_s2 = scalar_lea.vmem %s239_s27, 768  ;;  %p319_p11 = scmp.lt.s32.totalorder %s239_s27, %s239_s27 }
  0x21   :  { %260 = vmatpush3.msra.mxu1 %v50_v4  ;;  %106 = vmatpush1.msra.mxu0 %v45_v5  ;;  %v55_v11 = vsub.s32 0, %v54_v10  ;;  %v59_v13 = vsub.s32 1, %v54_v10  ;;  %v63_v14 = vsub.s32 2, %v54_v10  ;;  %p315_p10 = scmp.ne.s32.totalorder %s239_s27, %s314_s2  ;;  %p320_p12 = scmp.lt.s32.totalorder %s314_s2, %s314_s2 }
  0x22   :  { %261 = vmatprep.subr.mxu1 %v47_v7  ;;  %251 = vmatmul.mubr.msk.f32.vlgmr.msra.gmra.mxu0 %vm68_vm0, %v43_v6 }
  0x23   :  { %262 = vmatpush3.msra.mxu1 %v47_v7  ;;  %145 = vmatprep.mubr.f32.mxu0 %v346_v0  ;;  %v56_v15 = vrot.slane %v51_v12, %v55_v11  ;;  %v60_v16 = vrot.slane %v51_v12, %v59_v13  ;;  %v64_v17 = vrot.slane %v51_v12, %v63_v14  ;;  %p321_p13 = por %p320_p12, %p319_p11 }
  0x24   :  { %264 = vmatmul.mubr.msk.f32.vlgmr.msra.gmra.mxu1 %vm68_vm0, %v44_v8 }
  0x25   :  { %p322_p0 = pnand %p321_p13, %p315_p10 }
  0x26   :  { %252 = vmatmul.mubr.msk.f32.gmra.mxu0 %vm68_vm0, %v44_v8 }
  0xe2   :  { %v141_v18 = vpop.f32.mrf.mxu0 }
  0xe3   :  { %v142_v19 = vadd.f32 %v141_v18, %v56_v15 }
  0xe4   :  { %v143_v20 = vpop.f32.mrf.mxu0  ;;  %v265_v21 = vpop.f32.mrf.mxu1 }
  0xe5   :  { %227 = vst [vmem:[#allocation7] sm:$0xff] %v142_v19  ;;  %v144_v22 = vadd.f32 %v143_v20, %v60_v16  ;;  %v224_v23 = vadd.f32 %v265_v21, %v64_v17 }
  0xe6   :  { %v147_v24 = vpop.f32.mrf.mxu0  ;;  %v218_v25 = vpop.f32.mrf.mxu1 }
  0xe7   :  { %228 = vst [vmem:[#allocation7 + $0x8] sm:$0xff] %v144_v22  ;;  %232 = vst [vmem:[#allocation7 + $0x28] sm:$0xff] %v224_v23  ;;  %v148_v26 = vadd.f32 %v147_v24, %v56_v15  ;;  %v219_v27 = vadd.f32 %v218_v25, %v64_v17 }
  0xe8   :  { %v149_v28 = vpop.f32.mrf.mxu0 }
  0xe9   :  { %230 = vst [vmem:[#allocation7 + $0x18] sm:$0xff] %v148_v26  ;;  %229 = vst [vmem:[#allocation7 + $0x10] sm:$0xff] %v219_v27  ;;  %v150_v29 = vadd.f32 %v149_v28, %v60_v16 }
  0xeb   :  { %231 = vst [vmem:[#allocation7 + $0x20] sm:$0xff] %v150_v29 }
  0xec   :  { %325 = shalt.err (!%p322_p0)
}
  0xed   :  { %244 = dma.vmem_to_hbm [thread:$0]  %s239_s27, 768, %s389_s3, [#allocation4], %s344_s22, %s344_s22, %s345_s23  }
  0xee   :  { %338 = dma.done.wait [#allocation4], 768  }
  0xef   :  { %339 = vsyncadd [#allocation4], 4294966528 }
  0xf0   :  { %248 = vsyncpa [#allocation3], 1 }
  0xf1   :  { %249 = vsyncpa [#allocation6], 1 }
  0xf2   :  { %250 = vsyncpa [#allocation4], 1 }

</bundles_post_ra>
